<compile_context>
chip_gen: v7x
topology: tpu7x:2x2x1
jax: 0.10.0
libtpu: 0.0.40
codegen_flags: <defaults>
</compile_context>

<pallas_src>
import functools

import jax
import jax.numpy as jnp
from jax.experimental import pallas as pl
from jax.experimental.pallas import tpu as pltpu


def _gcn2_kernel(x_ref, adj_ref, eye_ref, w1_ref, b1_ref, w2_ref, b2_ref,
                 out_ref, *, mxu_dtype=jnp.float32):
    """Two stacked DenseGCNConv layers (+ ReLU) for one block of graphs.

    x_ref   : (Bblk, N, Fin)   VMEM
    adj_ref : (Bblk, N, N)     VMEM
    eye_ref : (N, N)           VMEM (shared across grid steps)
    w1_ref  : (Fin, H)         VMEM (pre-transposed vs torch Linear weight)
    b1_ref  : (1, H)           VMEM
    w2_ref  : (H, Fp)          VMEM (pre-transposed, zero-padded to Fp lanes)
    b2_ref  : (1, Fp)          VMEM (zero-padded)
    out_ref : (Bblk, N, Fp)    VMEM (lane-dense padded output)
    """
    bblk, n, fin = x_ref.shape
    h_dim = w1_ref.shape[1]
    fp = w2_ref.shape[1]

    x = x_ref[...].astype(jnp.float32)          # (Bblk, N, Fin)
    adj = adj_ref[...].astype(jnp.float32)      # (Bblk, N, N)
    eye = eye_ref[...].astype(jnp.float32)      # (N, N)

    # --- self loops: force diagonal to 1 via a resident eye mask ---
    adj_sl = adj * (1.0 - eye) + eye            # (Bblk, N, N)

    # --- symmetric normalization folded into vector scales ---
    deg = jnp.sum(adj_sl, axis=-1, keepdims=True)        # (Bblk, N, 1)
    d = jax.lax.rsqrt(jnp.maximum(deg, 1.0))             # (Bblk, N, 1)

    adj_mx = adj_sl.astype(mxu_dtype)

    # --- layer 1: relu(D A D (x W1) + b1) ---
    xw = jnp.dot(x.reshape(bblk * n, fin), w1_ref[...],
                 preferred_element_type=jnp.float32).reshape(bblk, n, h_dim)
    h = jnp.einsum("bmn,bnh->bmh", adj_mx, (d * xw).astype(mxu_dtype),
                   preferred_element_type=jnp.float32)
    h = d * h + b1_ref[...]
    h = jnp.maximum(h, 0.0)

    # --- layer 2: D A D (h W2) + b2 (W2/b2 padded -> lane-dense store) ---
    hw = jnp.dot(h.reshape(bblk * n, h_dim), w2_ref[...],
                 preferred_element_type=jnp.float32).reshape(bblk, n, fp)
    o = jnp.einsum("bmn,bnh->bmh", adj_mx, (d * hw).astype(mxu_dtype),
                   preferred_element_type=jnp.float32)
    o = d * o + b2_ref[...]

    out_ref[...] = o.astype(out_ref.dtype)


def gcn_model_forward(x, adj, w1, b1, w2, b2, *, batch_block=8,
                      mxu_dtype=jnp.float32):
    """Pallas-backed forward: conv2(relu(conv1(x, adj)), adj).

    x   : (B, N, Fin)  float32
    adj : (B, N, N)    float32
    w1  : (H, Fin)     torch-Linear-style weight (out, in)
    b1  : (H,)
    w2  : (Fout, H)
    b2  : (Fout,)
    mxu_dtype : dtype fed to the A@h matmuls (bf16 halves adj traffic and
                unlocks native MXU rate; f32 accumulation either way).
    returns (B, N, Fout) float32
    """
    B, N, Fin = x.shape
    H = w1.shape[0]
    Fout = w2.shape[0]

    LANE = 128
    Fp = ((Fout + LANE - 1) // LANE) * LANE           # lane-dense output width

    # --- pack several graphs per grid step, pad batch to a multiple ---
    bblk = min(batch_block, B)
    Bpad = ((B + bblk - 1) // bblk) * bblk
    if Bpad != B:
        pad = Bpad - B
        x = jnp.pad(x, ((0, pad), (0, 0), (0, 0)))
        adj = jnp.pad(adj, ((0, pad), (0, 0), (0, 0)))

    # --- weight / bias layout: pre-transpose, zero-pad to Fp lanes ---
    w1_t = jnp.transpose(w1).astype(jnp.float32)          # (Fin, H)
    w2_t = jnp.transpose(w2).astype(jnp.float32)          # (H, Fout)
    w2_p = jnp.pad(w2_t, ((0, 0), (0, Fp - Fout)))        # (H, Fp)
    b1_2d = b1.reshape(1, H).astype(jnp.float32)
    b2_p = jnp.pad(b2.reshape(1, Fout).astype(jnp.float32),
                   ((0, 0), (0, Fp - Fout)))              # (1, Fp)
    eye = jnp.eye(N, dtype=jnp.float32)

    # --- scoped-VMEM budget sized from the actual blocks ---
    f32 = 4
    block_bytes = (
        2 * bblk * N * N * f32          # adj block, double-buffered
        + 2 * bblk * N * Fin * f32      # x block, double-buffered
        + 2 * bblk * N * Fp * f32       # out block, double-buffered
        + (N * N + Fin * H + H * Fp + H + Fp) * f32 * 2  # shared operands
    )
    interm_bytes = bblk * N * (N + H + 2 * Fp) * f32      # adj_sl, h, hw, o
    vmem_limit = int(min(max(2 * (block_bytes + interm_bytes), 32 << 20),
                         64 << 20))    # v7x physical cap is 64 MiB / TC

    grid_spec = pltpu.PrefetchScalarGridSpec(
        num_scalar_prefetch=0,
        grid=(Bpad // bblk,),
        in_specs=[
            pl.BlockSpec((bblk, N, Fin), lambda b: (b, 0, 0)),
            pl.BlockSpec((bblk, N, N), lambda b: (b, 0, 0)),
            pl.BlockSpec((N, N), lambda b: (0, 0)),
            pl.BlockSpec((Fin, H), lambda b: (0, 0)),
            pl.BlockSpec((1, H), lambda b: (0, 0)),
            pl.BlockSpec((H, Fp), lambda b: (0, 0)),
            pl.BlockSpec((1, Fp), lambda b: (0, 0)),
        ],
        out_specs=pl.BlockSpec((bblk, N, Fp), lambda b: (b, 0, 0)),
    )

    out_padded = pl.pallas_call(
        functools.partial(_gcn2_kernel, mxu_dtype=mxu_dtype),
        out_shape=jax.ShapeDtypeStruct((Bpad, N, Fp), jnp.float32),
        grid_spec=grid_spec,
        compiler_params=pltpu.CompilerParams(
            dimension_semantics=("parallel",),
            vmem_limit_bytes=vmem_limit),
    )(x, adj, eye, w1_t, b1_2d, w2_p, b2_p)

    return out_padded[:B, :, :Fout]


def _reference_forward(x, adj, w1, b1, w2, b2):
    """Pure-JAX reference mirroring torch_geometric DenseGCNConv."""
    n = adj.shape[-1]
    eye = jnp.eye(n, dtype=adj.dtype)
    adj = jnp.where(eye > 0, 1.0, adj)
    deg = jnp.maximum(adj.sum(-1), 1.0)
    dis = deg ** -0.5
    norm_adj = dis[..., :, None] * adj * dis[..., None, :]

    h = jnp.einsum("bnf,hf->bnh", x, w1)
    h = jnp.einsum("bmn,bnh->bmh", norm_adj, h) + b1
    h = jnp.maximum(h, 0.0)
    o = jnp.einsum("bnh,oh->bno", h, w2)
    o = jnp.einsum("bmn,bno->bmo", norm_adj, o) + b2
    return o


if __name__ == "__main__":
    key = jax.random.PRNGKey(0)
    B, N = 2, 16
    in_channels, hidden_channels, out_channels = 8, 32, 16

    k_x, k_a, k_w1, k_b1, k_w2, k_b2 = jax.random.split(key, 6)

    x = jax.random.normal(k_x, (B, N, in_channels), dtype=jnp.float32)
    # symmetric 0/1 adjacency (no self loops; kernel adds them)
    a_raw = jax.random.uniform(k_a, (B, N, N))
    adj = (a_raw > 0.7).astype(jnp.float32)
    adj = jnp.maximum(adj, jnp.transpose(adj, (0, 2, 1)))
    adj = adj * (1.0 - jnp.eye(N, dtype=jnp.float32))

    # deterministic "glorot-ish" parameter init (synthetic, no checkpoint)
    w1 = jax.random.normal(k_w1, (hidden_channels, in_channels),
                           dtype=jnp.float32) * 0.2
    b1 = jax.random.normal(k_b1, (hidden_channels,), dtype=jnp.float32) * 0.05
    w2 = jax.random.normal(k_w2, (out_channels, hidden_channels),
                           dtype=jnp.float32) * 0.2
    b2 = jax.random.normal(k_b2, (out_channels,), dtype=jnp.float32) * 0.05

    out = gcn_model_forward(x, adj, w1, b1, w2, b2)
    out = jax.block_until_ready(out)

    ref = _reference_forward(x, adj, w1, b1, w2, b2)
    assert out.shape == (B, N, out_channels)
    assert jnp.allclose(out, ref, atol=1e-3, rtol=1e-3), "mismatch vs reference"

    print("KERNEL_OK")
</pallas_src>

<mosaic_0001>
module attributes {stable_mosaic.version = 11 : i64} {
  func.func @_gcn2_kernel(%arg0: i32, %arg1: memref<2x16x8xf32, #tpu.memory_space<vmem>>, %arg2: memref<2x16x16xf32, #tpu.memory_space<vmem>>, %arg3: memref<16x16xf32, #tpu.memory_space<vmem>>, %arg4: memref<8x32xf32, #tpu.memory_space<vmem>>, %arg5: memref<1x32xf32, #tpu.memory_space<vmem>>, %arg6: memref<32x128xf32, #tpu.memory_space<vmem>>, %arg7: memref<1x128xf32, #tpu.memory_space<vmem>>, %arg8: memref<2x16x128xf32, #tpu.memory_space<vmem>>) attributes {dimension_semantics = [#tpu.dimension_semantics<parallel>], iteration_bounds = array<i64: 1>, scalar_prefetch = 0 : i64, scratch_operands = 0 : i64, tpu.core_type = #tpu.core_type<tc>, window_params = [{transform_indices = @transform_0, window_bounds = array<i64: 2, 16, 8>}, {transform_indices = @transform_1, window_bounds = array<i64: 2, 16, 16>}, {pipeline_mode = #tpu.pipeline_mode<synchronous>, transform_indices = @transform_2, window_bounds = array<i64: 16, 16>}, {pipeline_mode = #tpu.pipeline_mode<synchronous>, transform_indices = @transform_3, window_bounds = array<i64: 8, 32>}, {pipeline_mode = #tpu.pipeline_mode<synchronous>, transform_indices = @transform_4, window_bounds = array<i64: 1, 32>}, {pipeline_mode = #tpu.pipeline_mode<synchronous>, transform_indices = @transform_5, window_bounds = array<i64: 32, 128>}, {pipeline_mode = #tpu.pipeline_mode<synchronous>, transform_indices = @transform_6, window_bounds = array<i64: 1, 128>}, {transform_indices = @transform_7, window_bounds = array<i64: 2, 16, 128>}]} {
    %c0 = arith.constant 0 : index
    %c0_0 = arith.constant 0 : index
    %c0_1 = arith.constant 0 : index
    %0 = vector.load %arg1[%c0, %c0_0, %c0_1] : memref<2x16x8xf32, #tpu.memory_space<vmem>>, vector<2x16x8xf32>
    %c0_2 = arith.constant 0 : index
    %c0_3 = arith.constant 0 : index
    %c0_4 = arith.constant 0 : index
    %1 = vector.load %arg2[%c0_2, %c0_3, %c0_4] : memref<2x16x16xf32, #tpu.memory_space<vmem>>, vector<2x16x16xf32>
    %c0_5 = arith.constant 0 : index
    %c0_6 = arith.constant 0 : index
    %2 = vector.load %arg3[%c0_5, %c0_6] : memref<16x16xf32, #tpu.memory_space<vmem>>, vector<16x16xf32>
    %cst = arith.constant 1.000000e+00 : f32
    %3 = vector.broadcast %cst : f32 to vector<16x16xf32>
    %4 = arith.subf %3, %2 : vector<16x16xf32>
    %5 = vector.shape_cast %4 : vector<16x16xf32> to vector<1x16x16xf32>
    %6 = vector.broadcast %5 : vector<1x16x16xf32> to vector<2x16x16xf32>
    %7 = arith.mulf %1, %6 : vector<2x16x16xf32>
    %8 = vector.shape_cast %2 : vector<16x16xf32> to vector<1x16x16xf32>
    %9 = vector.broadcast %8 : vector<1x16x16xf32> to vector<2x16x16xf32>
    %10 = arith.addf %7, %9 : vector<2x16x16xf32>
    %cst_7 = arith.constant dense<0.000000e+00> : vector<2x16xf32>
    %11 = vector.multi_reduction <add>, %10, %cst_7 [2] : vector<2x16x16xf32> to vector<2x16xf32>
    %12 = vector.shape_cast %11 : vector<2x16xf32> to vector<2x16x1xf32>
    %cst_8 = arith.constant 1.000000e+00 : f32
    %13 = vector.broadcast %cst_8 : f32 to vector<2x16x1xf32>
    %14 = arith.maximumf %12, %13 : vector<2x16x1xf32>
    %15 = math.rsqrt %14 : vector<2x16x1xf32>
    %16 = vector.shape_cast %0 : vector<2x16x8xf32> to vector<32x8xf32>
    %c0_9 = arith.constant 0 : index
    %c0_10 = arith.constant 0 : index
    %17 = vector.load %arg4[%c0_9, %c0_10] : memref<8x32xf32, #tpu.memory_space<vmem>>, vector<8x32xf32>
    %cst_11 = arith.constant dense<0.000000e+00> : vector<32x32xf32>
    %18 = tpu.matmul %16, %17, %cst_11 {dimension_numbers = #tpu.dot_dimension_numbers<[1], [0], [0], [1], [0, 0, 1, 1], [], []>} : vector<32x8xf32>, vector<8x32xf32>, vector<32x32xf32> -> vector<32x32xf32>
    %19 = vector.shape_cast %18 : vector<32x32xf32> to vector<2x16x32xf32>
    %20 = vector.broadcast %15 : vector<2x16x1xf32> to vector<2x16x32xf32>
    %21 = arith.mulf %20, %19 : vector<2x16x32xf32>
    "tpu.trace_start"() <{level = 10 : i32, message = "bmn,bnh->bmh"}> : () -> ()
    %cst_12 = arith.constant dense<0.000000e+00> : vector<2x16x32xf32>
    %22 = tpu.matmul %10, %21, %cst_12 {dimension_numbers = #tpu.dot_dimension_numbers<[2], [1], [1], [2], [0, 0, 0, 1, 1, 2], [0], [0]>} : vector<2x16x16xf32>, vector<2x16x32xf32>, vector<2x16x32xf32> -> vector<2x16x32xf32>
    "tpu.trace_stop"() : () -> ()
    %23 = vector.broadcast %15 : vector<2x16x1xf32> to vector<2x16x32xf32>
    %24 = arith.mulf %23, %22 : vector<2x16x32xf32>
    %c0_13 = arith.constant 0 : index
    %c0_14 = arith.constant 0 : index
    %25 = vector.load %arg5[%c0_13, %c0_14] : memref<1x32xf32, #tpu.memory_space<vmem>>, vector<1x32xf32>
    %26 = vector.shape_cast %25 : vector<1x32xf32> to vector<1x1x32xf32>
    %27 = vector.broadcast %26 : vector<1x1x32xf32> to vector<2x16x32xf32>
    %28 = arith.addf %24, %27 : vector<2x16x32xf32>
    %cst_15 = arith.constant 0.000000e+00 : f32
    %29 = vector.broadcast %cst_15 : f32 to vector<2x16x32xf32>
    %30 = arith.maximumf %28, %29 : vector<2x16x32xf32>
    %31 = vector.shape_cast %30 : vector<2x16x32xf32> to vector<32x32xf32>
    %c0_16 = arith.constant 0 : index
    %c0_17 = arith.constant 0 : index
    %32 = vector.load %arg6[%c0_16, %c0_17] : memref<32x128xf32, #tpu.memory_space<vmem>>, vector<32x128xf32>
    %cst_18 = arith.constant dense<0.000000e+00> : vector<32x128xf32>
    %33 = tpu.matmul %31, %32, %cst_18 {dimension_numbers = #tpu.dot_dimension_numbers<[1], [0], [0], [1], [0, 0, 1, 1], [], []>} : vector<32x32xf32>, vector<32x128xf32>, vector<32x128xf32> -> vector<32x128xf32>
    %34 = vector.shape_cast %33 : vector<32x128xf32> to vector<2x16x128xf32>
    %35 = vector.broadcast %15 : vector<2x16x1xf32> to vector<2x16x128xf32>
    %36 = arith.mulf %35, %34 : vector<2x16x128xf32>
    "tpu.trace_start"() <{level = 10 : i32, message = "bmn,bnh->bmh"}> : () -> ()
    %cst_19 = arith.constant dense<0.000000e+00> : vector<2x16x128xf32>
    %37 = tpu.matmul %10, %36, %cst_19 {dimension_numbers = #tpu.dot_dimension_numbers<[2], [1], [1], [2], [0, 0, 0, 1, 1, 2], [0], [0]>} : vector<2x16x16xf32>, vector<2x16x128xf32>, vector<2x16x128xf32> -> vector<2x16x128xf32>
    "tpu.trace_stop"() : () -> ()
    %38 = vector.broadcast %15 : vector<2x16x1xf32> to vector<2x16x128xf32>
    %39 = arith.mulf %38, %37 : vector<2x16x128xf32>
    %c0_20 = arith.constant 0 : index
    %c0_21 = arith.constant 0 : index
    %40 = vector.load %arg7[%c0_20, %c0_21] : memref<1x128xf32, #tpu.memory_space<vmem>>, vector<1x128xf32>
    %41 = vector.shape_cast %40 : vector<1x128xf32> to vector<1x1x128xf32>
    %42 = vector.broadcast %41 : vector<1x1x128xf32> to vector<2x16x128xf32>
    %43 = arith.addf %39, %42 : vector<2x16x128xf32>
    %c0_22 = arith.constant 0 : index
    %c0_23 = arith.constant 0 : index
    %c0_24 = arith.constant 0 : index
    %44 = vector.load %arg8[%c0_22, %c0_23, %c0_24] : memref<2x16x128xf32, #tpu.memory_space<vmem>>, vector<2x16x128xf32>
    tpu.vector_store %arg8[%c0_22, %c0_23, %c0_24], %43 {strides = array<i32>} : memref<2x16x128xf32, #tpu.memory_space<vmem>>, vector<2x16x128xf32>,
    return
  }
  func.func @transform_0(%arg0: i32) -> (i32, i32, i32) {
    %c0_i32 = arith.constant 0 : i32
    %c0_i32_0 = arith.constant 0 : i32
    %c0_i32_1 = arith.constant 0 : i32
    return %arg0, %c0_i32, %c0_i32_0 : i32, i32, i32
  }
  func.func @transform_1(%arg0: i32) -> (i32, i32, i32) {
    %c0_i32 = arith.constant 0 : i32
    %c0_i32_0 = arith.constant 0 : i32
    %c0_i32_1 = arith.constant 0 : i32
    return %arg0, %c0_i32, %c0_i32_0 : i32, i32, i32
  }
  func.func @transform_2(%arg0: i32) -> (i32, i32) {
    %c0_i32 = arith.constant 0 : i32
    %c0_i32_0 = arith.constant 0 : i32
    %c0_i32_1 = arith.constant 0 : i32
    return %c0_i32, %c0_i32_0 : i32, i32
  }
  func.func @transform_3(%arg0: i32) -> (i32, i32) {
    %c0_i32 = arith.constant 0 : i32
    %c0_i32_0 = arith.constant 0 : i32
    %c0_i32_1 = arith.constant 0 : i32
    return %c0_i32, %c0_i32_0 : i32, i32
  }
  func.func @transform_4(%arg0: i32) -> (i32, i32) {
    %c0_i32 = arith.constant 0 : i32
    %c0_i32_0 = arith.constant 0 : i32
    %c0_i32_1 = arith.constant 0 : i32
    return %c0_i32, %c0_i32_0 : i32, i32
  }
  func.func @transform_5(%arg0: i32) -> (i32, i32) {
    %c0_i32 = arith.constant 0 : i32
    %c0_i32_0 = arith.constant 0 : i32
    %c0_i32_1 = arith.constant 0 : i32
    return %c0_i32, %c0_i32_0 : i32, i32
  }
  func.func @transform_6(%arg0: i32) -> (i32, i32) {
    %c0_i32 = arith.constant 0 : i32
    %c0_i32_0 = arith.constant 0 : i32
    %c0_i32_1 = arith.constant 0 : i32
    return %c0_i32, %c0_i32_0 : i32, i32
  }
  func.func @transform_7(%arg0: i32) -> (i32, i32, i32) {
    %c0_i32 = arith.constant 0 : i32
    %c0_i32_0 = arith.constant 0 : i32
    %c0_i32_1 = arith.constant 0 : i32
    return %arg0, %c0_i32, %c0_i32_0 : i32, i32, i32
  }
}

</mosaic_0001>

<bundles_post_ra>
// kernel: tpu_custom_call.1
= control target key start
LH: loop header
LB: loop body
LE: loop exit
PB: predicated region body
PF: predicated region fallthrough
CT: control target
= control target key end

     0   :  { %12 = vsyncpa [#allocation3], 0  ;;  %s1061_s0 = inlined_call_operand.vmem [shape: f32[2,16,8], index: 0, kind: input, shape index: {}]   ;;  %s1062_s1 = inlined_call_operand.vmem [shape: f32[2,16,16], index: 1, kind: input, shape index: {}]   ;;  %s1063_s2 = inlined_call_operand.hbm [shape: f32[16,16], index: 2, kind: input, shape index: {}]   ;;  %s1064_s3 = inlined_call_operand.hbm [shape: f32[8,32], index: 3, kind: input, shape index: {}]   ;;  %s1065_s4 = inlined_call_operand.vmem [shape: f32[1,32], index: 4, kind: input, shape index: {}]   ;;  %s1066_s5 = inlined_call_operand.vmem [shape: f32[32,128], index: 5, kind: input, shape index: {}]   ;;  %s1067_s6 = inlined_call_operand.vmem [shape: f32[1,128], index: 6, kind: input, shape index: {}]   ;;  %s1068_s7 = inlined_call_operand.hbm [shape: f32[2,16,128], index: 7, kind: output, shape index: {}]  }
   0x1   :  { %13 = vsyncpa [#allocation6], 0 }
   0x2   :  { %14 = vsyncpa [#allocation4], 0  ;;  %s877_s24 = smov [#allocation2]   ;;  %s805_s28 = scalar_lea.hbm %s1063_s2, 256 }
   0x3   :  { %s24_s25 = sshll.u32 %s877_s24, 4  ;;  %p806_p0 = scmp.ne.s32.totalorder %s1063_s2, %s805_s28  ;;  %s25_s25 = int_to_ptr.vmem [resolvable:$true] %s24_s25 }
   0x4   :  { %p809_p1 = scmp.lt.u32.totalorder %s805_s28, %s1063_s2 }
   0x6   :  { %p811_p2 = pnand %p809_p1, %p806_p0 }
   0x8   :  { %814 = shalt.err (!%p811_p2)
}
   0x9   :  { %s815_s10 = scalar_lea.vmem %s25_s25, 256  ;;  %p820_p4 = scmp.lt.s32.totalorder %s25_s25, %s25_s25 }
   0xa   :  { %p816_p3 = scmp.ne.s32.totalorder %s25_s25, %s815_s10  ;;  %p821_p5 = scmp.lt.s32.totalorder %s815_s10, %s815_s10 }
   0xc   :  { %p822_p6 = por %p821_p5, %p820_p4 }
   0xe   :  { %p823_p7 = pnand %p822_p6, %p816_p3 }
  0x10   :  { %826 = shalt.err (!%p823_p7)
}
  0x11   :  { %s878_s11 = smov 128   ;;  %s879_s12 = smov 8  }
  0x12   :  { %30 = dma.hbm_to_vmem [thread:$0]  %s1063_s2, 256, %s25_s25, [#allocation3], %s878_s11, %s878_s11, %s879_s12  }
  0x13   :  { %s880_s15 = smov [#allocation5]   ;;  %s827_s19 = scalar_lea.hbm %s1064_s3, 128 }
  0x14   :  { %s37_s16 = sshll.u32 %s880_s15, 4  ;;  %p828_p8 = scmp.ne.s32.totalorder %s1064_s3, %s827_s19  ;;  %s38_s16 = int_to_ptr.vmem [resolvable:$true] %s37_s16 }
  0x15   :  { %p831_p9 = scmp.lt.u32.totalorder %s827_s19, %s1064_s3 }
  0x17   :  { %p833_p10 = pnand %p831_p9, %p828_p8 }
  0x19   :  { %836 = shalt.err (!%p833_p10)
}
  0x1a   :  { %s837_s24 = scalar_lea.vmem %s38_s16, 128  ;;  %p842_p12 = scmp.lt.s32.totalorder %s38_s16, %s38_s16 }
  0x1b   :  { %p838_p11 = scmp.ne.s32.totalorder %s38_s16, %s837_s24  ;;  %p843_p13 = scmp.lt.s32.totalorder %s837_s24, %s837_s24 }
  0x1d   :  { %p844_p0 = por %p843_p13, %p842_p12 }
  0x1f   :  { %p845_p1 = pnand %p844_p0, %p838_p11 }
  0x21   :  { %848 = shalt.err (!%p845_p1)
}
  0x22   :  { %40 = dma.hbm_to_vmem [thread:$0]  %s1064_s3, 128, %s38_s16, [#allocation6]  }
  0x23   :  { %871 = dma.done.wait [#allocation3], 256  }
  0x24   :  { %872 = vsyncadd [#allocation3], 4294967040 }
  0x25   :  { %873 = dma.done.wait [#allocation6], 128  }
  0x26   :  { %874 = vsyncadd [#allocation6], 4294967168  ;;  %vm95_vm0 = vcmask 64512   ;;  %v94_v0 = vld [vmem:[#allocation5] sm:$0xff]  ;;  %v53_v1 = vld [vmem:[%s1061_s0] sm:$0xff]  ;;  %vm73_vm1 = vcmask 130048  }
  0x27   :  { %v54_v2 = vld [vmem:[%s1061_s0 + $0x8] sm:$0xff]  ;;  %718 = vmatprep.subr.mxu0 %v94_v0  ;;  %720 = vmatprep.mubr.msk.f32.mxu0 %vm95_vm0, %v53_v1  ;;  %v55_v3 = vld [vmem:[%s1061_s0 + $0x10] sm:$0xff]  ;;  %v57_v4 = vld [vmem:[%s1062_s1] sm:$0xff]  ;;  %vm382_vm2 = vcmask 261120   ;;  %s881_s27 = smov [#allocation7]  }
  0x28   :  { %719 = vmatpush3.msra.mxu0 %v94_v0  ;;  %v61_v5 = vld [vmem:[#allocation2] sm:$0xff]  ;;  %v59_v6 = vld [vmem:[%s1062_s1 + $0x10] sm:$0xff]  ;;  %v58_v8 = vld [vmem:[%s1062_s1 + $0x8] sm:$0xff]  ;;  %s658_s28 = sshll.u32 %s881_s27, 4  ;;  %s659_s28 = int_to_ptr.vmem [resolvable:$true] %s658_s28 }
  0x29   :  { %721 = vmatmul.mubr.msk.f32.vlgmr.msra.gmra.mrb[0].mxu0 %vm95_vm0, %v54_v2  ;;  %v63_v7 = vsub.f32 1.0, %v61_v5  ;;  %v62_v9 = vld [vmem:[#allocation2 + $0x8] sm:$0xff]  ;;  %v60_v10 = vld [vmem:[%s1062_s1 + $0x18] sm:$0xff]  ;;  %v378_v47 = vld [vmem:[%s1066_s5] sm:$0xff]  ;;  %p854_p3 = scmp.lt.s32.totalorder %s659_s28, %s659_s28 }
  0x2a   :  { %723 = vmatprep.mubr.msk.f32.mxu0 %vm95_vm0, %v55_v3  ;;  %v56_v11 = vld [vmem:[%s1061_s0 + $0x18] sm:$0xff]  ;;  %v64_v12 = vsub.f32 1.0, %v62_v9  ;;  %v379_v48 = vld [vmem:[%s1066_s5 + $0x8] sm:$0xff]  ;;  %v380_v50 = vld [vmem:[%s1066_s5 + $0x10] sm:$0xff] }
  0x2b   :  { %v65_v13 = vmul.f32 %v63_v7, %v57_v4  ;;  %v67_v14 = vmul.f32 %v63_v7, %v59_v6  ;;  %v776_v49 = vpack.c.bf16 %v379_v48, %v378_v47  ;;  %v381_v51 = vld [vmem:[%s1066_s5 + $0x18] sm:$0xff]  ;;  %v679_v54 = vld [vmem:[%s1065_s4] ss:$0 sm:$0xff] }
  0x2c   :  { %v66_v15 = vmul.f32 %v64_v12, %v58_v8  ;;  %v68_v16 = vmul.f32 %v64_v12, %v60_v10  ;;  %v780_v52 = vpack.c.bf16 %v381_v51, %v380_v50 }
  0x2d   :  { %724 = vmatmul.mubr.msk.f32.gmra.mrb[2].mxu0 %vm95_vm0, %v56_v11  ;;  %v69_v17 = vadd.f32 %v65_v13, %v61_v5  ;;  %v977_v18 = vadd.f32 %v67_v14, %v61_v5  ;;  %777 = vmatprep.subr.bf16.mxu0 %v776_v49 }
  0x2e   :  { %v979_v19 = vadd.f32 %v66_v15, %v62_v9  ;;  %v981_v20 = vadd.f32 %v68_v16, %v62_v9  ;;  %779 = vmatpush3.bf16.msra.mxu0 %v776_v49 }
  0x2f   :  { %v74_v21 = vsel %vm73_vm1, %v69_v17, 0.0  ;;  %v80_v22 = vsel %vm73_vm1, %v977_v18, 0.0  ;;  %730 = vmatprep.mubr.msk.f32.mxu1 %vm73_vm1, %v69_v17  ;;  %781 = vmatprep.subr.bf16.mxu0 %v780_v52 }
  0x30   :  { %75 = vadd.xlane.f32.xlu0 %v74_v21  ;;  %81 = vadd.xlane.f32.xlu1 %v80_v22  ;;  %v77_v23 = vsel %vm73_vm1, %v979_v19, 0.0  ;;  %v83_v24 = vsel %vm73_vm1, %v981_v20, 0.0 }
  0x32   :  { %783 = vmatpush3.bf16.msra.mxu0 %v780_v52 }
  0x34   :  { %78 = vadd.xlane.f32.xlu0 %v77_v23  ;;  %84 = vadd.xlane.f32.xlu1 %v83_v24 }
  0xbd   :  { %v76_v25 = vpop.xlane.xlu0 %75  ;;  %v82_v26 = vpop.xlane.xlu1 %81 }
  0xbe   :  { %v86_v30 = vmax.f32 %v76_v25, 1.0  ;;  %v88_v32 = vmax.f32 %v82_v26, 1.0 }
  0xc1   :  { %v79_v27 = vpop.xlane.xlu0 %78  ;;  %v85_v29 = vpop.xlane.xlu1 %84 }
  0xc2   :  { %v87_v28 = vmax.f32 %v79_v27, 1.0  ;;  %v89_v31 = vmax.f32 %v85_v29, 1.0 }
  0xc4   :  { %797 = vrsqrt.f32 %v87_v28 }
  0xc5   :  { %799 = vrsqrt.f32 %v86_v30 }
  0xc6   :  { %801 = vrsqrt.f32 %v89_v31 }
  0xc7   :  { %803 = vrsqrt.f32 %v88_v32 }
  0xce   :  { %v991_v33 = vpop.eup %797 }
  0xcf   :  { %v993_v35 = vpop.eup %799 }
  0xd0   :  { %v996_v38 = vpop.eup %801 }
  0xd1   :  { %v999_v42 = vpop.eup %803 }
  0xfc   :  { %v722_v34 = vpop.f32.mrb[0].mxu0 }
  0xfd   :  { %v194_v36 = vmul.f32 %v991_v33, %v722_v34  ;;  %v174_v37 = vpop.f32.mrb[1].mxu0 }
  0xfe   :  { %v193_v39 = vmul.f32 %v993_v35, %v174_v37 }
 0x100   :  { %v725_v40 = vpop.f32.mrb[2].mxu0  ;;  %v768_v41 = vpack.c.bf16 %v194_v36, %v193_v39 }
 0x101   :  { %v196_v43 = vmul.f32 %v996_v38, %v725_v40  ;;  %v184_v44 = vpop.f32.mrb[3].mxu0 }
 0x102   :  { %v195_v45 = vmul.f32 %v999_v42, %v184_v44  ;;  %769 = vmatprep.subr.bf16.mxu1 %v768_v41 }
 0x103   :  { %771 = vmatpush3.bf16.msra.mxu1 %v768_v41 }
 0x104   :  { %v772_v46 = vpack.c.bf16 %v196_v43, %v195_v45 }
 0x106   :  { %731 = vmatmul.mubr.msk.f32.vlgmr.msra.gmra.mrb[0].mxu1 %vm73_vm1, %v979_v19  ;;  %773 = vmatprep.subr.bf16.mxu1 %v772_v46 }
 0x107   :  { %775 = vmatpush3.bf16.msra.mxu1 %v772_v46  ;;  %737 = vmatprep.mubr.msk.f32.mxu1 %vm73_vm1, %v977_v18 }
 0x10a   :  { %738 = vmatmul.mubr.msk.f32.vlgmr.msra.gmra.mrb[2].mxu1 %vm73_vm1, %v981_v20 }
 0x10b   :  { %758 = vmatprep.mubr.msk.f32.mxu1 %vm73_vm1, %v69_v17  ;;  %v688_v17 = vld [vmem:[%s1067_s6] ss:$0 sm:$0xff]  ;;  %s849_s6 = scalar_lea.vmem %s659_s28, 512 }
 0x10c   :  { %p850_p2 = scmp.ne.s32.totalorder %s659_s28, %s849_s6  ;;  %p855_p4 = scmp.lt.s32.totalorder %s849_s6, %s849_s6 }
 0x10e   :  { %p856_p5 = por %p855_p4, %p854_p3 }
 0x110   :  { %p857_p6 = pnand %p856_p5, %p850_p2 }
 0x1d9   :  { %v732_v53 = vpop.f32.mrb[0].mxu1 }
 0x1da   :  { %v360_v55 = vmul.f32 %v991_v33, %v732_v53  ;;  %v269_v56 = vpop.f32.mrb[1].mxu1 }
 0x1db   :  { %v359_v57 = vmul.f32 %v993_v35, %v269_v56 }
 0x1dc   :  { %v371_v58 = vadd.f32 %v679_v54, %v360_v55 }
 0x1dd   :  { %v370_v59 = vadd.f32 %v679_v54, %v359_v57  ;;  %v739_v60 = vpop.f32.mrb[2].mxu1 }
 0x1de   :  { %v362_v61 = vmul.f32 %v996_v38, %v739_v60  ;;  %v350_v62 = vpop.f32.mrb[3].mxu1  ;;  %v375_v1 = vmax.f32 %v371_v58, 0.0 }
 0x1df   :  { %v374_v63 = vmax.f32 %v370_v59, 0.0  ;;  %v361_v0 = vmul.f32 %v999_v42, %v350_v62 }
 0x1e0   :  { %v373_v2 = vadd.f32 %v679_v54, %v362_v61 }
 0x1e1   :  { %v372_v3 = vadd.f32 %v679_v54, %v361_v0  ;;  %748 = vmatprep.mubr.msk.f32.mxu0 %vm382_vm2, %v374_v63 }
 0x1e2   :  { %749 = vmatmul.mubr.msk.f32.vlgmr.msra.gmra.mrb[4].mxu0 %vm382_vm2, %v375_v1  ;;  %v377_v5 = vmax.f32 %v373_v2, 0.0 }
 0x1e3   :  { %v376_v4 = vmax.f32 %v372_v3, 0.0 }
 0x1e5   :  { %751 = vmatprep.mubr.msk.f32.mxu0 %vm382_vm2, %v376_v4 }
 0x1e6   :  { %752 = vmatmul.mubr.msk.f32.gmra.mrb[6].mxu0 %vm382_vm2, %v377_v5 }
 0x2b5   :  { %v750_v6 = vpop.f32.mrb[4].mxu0 }
 0x2b6   :  { %v481_v7 = vmul.f32 %v991_v33, %v750_v6  ;;  %v461_v8 = vpop.f32.mrb[5].mxu0 }
 0x2b7   :  { %v480_v9 = vmul.f32 %v993_v35, %v461_v8 }
 0x2b9   :  { %v784_v10 = vpack.c.bf16 %v481_v7, %v480_v9  ;;  %v753_v11 = vpop.f32.mrb[6].mxu0 }
 0x2ba   :  { %v483_v12 = vmul.f32 %v996_v38, %v753_v11  ;;  %v471_v13 = vpop.f32.mrb[7].mxu0 }
 0x2bb   :  { %v482_v14 = vmul.f32 %v999_v42, %v471_v13  ;;  %785 = vmatprep.subr.bf16.mxu1 %v784_v10 }
 0x2bc   :  { %787 = vmatpush3.bf16.msra.mxu1 %v784_v10 }
 0x2bd   :  { %v788_v15 = vpack.c.bf16 %v483_v12, %v482_v14 }
 0x2bf   :  { %759 = vmatmul.mubr.msk.f32.vlgmr.msra.gmra.mrb[4].mxu1 %vm73_vm1, %v979_v19  ;;  %789 = vmatprep.subr.bf16.mxu1 %v788_v15 }
 0x2c0   :  { %791 = vmatpush3.bf16.msra.mxu1 %v788_v15  ;;  %765 = vmatprep.mubr.msk.f32.mxu1 %vm73_vm1, %v977_v18 }
 0x2c3   :  { %766 = vmatmul.mubr.msk.f32.vlgmr.msra.gmra.mrb[6].mxu1 %vm73_vm1, %v981_v20 }
 0x392   :  { %v760_v16 = vpop.f32.mrb[4].mxu1 }
 0x393   :  { %v635_v21 = vmul.f32 %v991_v33, %v760_v16  ;;  %v550_v22 = vpop.f32.mrb[5].mxu1 }
 0x394   :  { %v634_v23 = vmul.f32 %v993_v35, %v550_v22 }
 0x395   :  { %v646_v24 = vadd.f32 %v688_v17, %v635_v21 }
 0x396   :  { %v645_v19 = vadd.f32 %v688_v17, %v634_v23  ;;  %v767_v25 = vpop.f32.mrb[6].mxu1 }
 0x397   :  { %650 = vst [vmem:[#allocation7 + $0x8] sm:$0xff] %v646_v24  ;;  %v637_v26 = vmul.f32 %v996_v38, %v767_v25  ;;  %v625_v18 = vpop.f32.mrb[7].mxu1 }
 0x398   :  { %649 = vst [vmem:[#allocation7] sm:$0xff] %v645_v19  ;;  %v636_v20 = vmul.f32 %v999_v42, %v625_v18 }
 0x399   :  { %v648_v27 = vadd.f32 %v688_v17, %v637_v26 }
 0x39a   :  { %v647_v28 = vadd.f32 %v688_v17, %v636_v20 }
 0x39b   :  { %652 = vst [vmem:[#allocation7 + $0x18] sm:$0xff] %v648_v27 }
 0x39c   :  { %651 = vst [vmem:[#allocation7 + $0x10] sm:$0xff] %v647_v28 }
 0x39d   :  { %860 = shalt.err (!%p857_p6)
}
 0x39e   :  { %s861_s8 = scalar_lea.hbm %s1068_s7, 512 }
 0x39f   :  { %p862_p7 = scmp.ne.s32.totalorder %s1068_s7, %s861_s8  ;;  %p865_p8 = scmp.lt.u32.totalorder %s861_s8, %s1068_s7 }
 0x3a1   :  { %p867_p9 = pnand %p865_p8, %p862_p7 }
 0x3a3   :  { %870 = shalt.err (!%p867_p9)
}
 0x3a4   :  { %664 = dma.vmem_to_hbm [thread:$0]  %s659_s28, 512, %s1068_s7, [#allocation4], %s878_s11, %s878_s11, %s879_s12  }
 0x3a5   :  { %875 = dma.done.wait [#allocation4], 512  }
 0x3a6   :  { %876 = vsyncadd [#allocation4], 4294966784 }
 0x3a7   :  { %668 = vsyncpa [#allocation3], 1 }
 0x3a8   :  { %669 = vsyncpa [#allocation6], 1 }
 0x3a9   :  { %670 = vsyncpa [#allocation4], 1 }

</bundles_post_ra>
